<compile_context>
chip_gen: v7x
topology: tpu7x:2x2x1
jax: 0.10.0
libtpu: 0.0.40
codegen_flags: <defaults>
</compile_context>

<pallas_src>
import functools

import jax
import jax.numpy as jnp
import numpy as np
from jax.experimental import pallas as pl
from jax.experimental.pallas import tpu as pltpu


def _dgcn_kernel(m_ref, x_ref, w_ref, b_ref, o_ref, *, K):
    """One grid step handles B_blk batches.

    m_ref: (M, M)                bf16, kron(adj.T, I_L), grid-resident
    x_ref: (B_blk*C, M)          f32 stacked features, rows ordered (b, c)
    w_ref: (B_blk*O, K*B_blk*C)  f32 batch-block-diagonal fused conv weight
    b_ref: (B_blk*O, 1)          f32 bias (tiled over the batch block)
    o_ref: (B_blk*O, M)          f32 output, rows ordered (b, o)
    """
    m = m_ref[...]
    z_prev = x_ref[...]                                   # Z_0 = x (f32 carry)
    zs = [z_prev]
    if K > 1:
        z_cur = jnp.dot(z_prev.astype(jnp.bfloat16), m,
                        preferred_element_type=jnp.float32)   # Z_1 = x @ M_adj
        zs.append(z_cur)
        for _ in range(2, K):                             # static unroll (K small)
            z_next = 2.0 * jnp.dot(z_cur.astype(jnp.bfloat16), m,
                                   preferred_element_type=jnp.float32) - z_prev
            z_prev, z_cur = z_cur, z_next
            zs.append(z_cur)
    # Rows ordered (k, b, c); sublane-aligned 8-row tiles -> cheap concat.
    z_all = jnp.concatenate(zs, axis=0)                   # (K*B_blk*C, M)
    out = jnp.dot(w_ref[...], z_all,
                  preferred_element_type=jnp.float32) + b_ref[...]
    o_ref[...] = out.astype(o_ref.dtype)


def _pick_batch_block(B, C, *, max_rows=512):
    """Largest divisor of B whose stacked slab has sublane-aligned rows."""
    for d in range(B, 0, -1):
        if B % d == 0 and d * C <= max_rows and ((d * C) % 8 == 0 or d == B):
            return d
    return B


def dgcn_prepare(adj, w, bias, *, L, K, B_blk):
    """Batch-invariant operands.  Hoist/cache this when adj & w are fixed."""
    O, CK = w.shape
    assert CK % K == 0
    C = CK // K
    # Expanded propagation operator (feature form): z_flat -> z_flat @ kron(adj.T, I_L).
    m_op = jnp.kron(adj.T.astype(jnp.float32),
                    jnp.eye(L, dtype=jnp.float32)).astype(jnp.bfloat16)
    # PyTorch channel ordering j = c*K + k  ->  wp[o, k, c] = w[o, c*K + k]
    wp = w.astype(jnp.float32).reshape(O, C, K).transpose(0, 2, 1)
    # Batch-block-diagonal fused weight:
    #   W_big[b*O + o, k*B_blk*C + d*C + c] = wp[o, k, c] * delta(b, d)
    eye_b = jnp.eye(B_blk, dtype=jnp.float32)
    w_big = jnp.einsum('okc,bd->bokdc', wp, eye_b).reshape(
        B_blk * O, K * B_blk * C)
    bias_big = jnp.tile(bias.astype(jnp.float32), (B_blk,)).reshape(B_blk * O, 1)
    return m_op, w_big, bias_big


@functools.partial(jax.jit, static_argnames=("K", "B_blk"))
def dgcn_apply(x, m_op, w_big, bias_big, *, K, B_blk):
    B, C, N, L = x.shape
    M = N * L
    assert B % B_blk == 0
    O = w_big.shape[0] // B_blk
    BC = B_blk * C
    x_flat = x.astype(jnp.float32).reshape(B * C, M)      # rows (b, c), lanes (n, l)
    n_blk = B // B_blk

    kernel = functools.partial(_dgcn_kernel, K=K)
    out_flat = pl.pallas_call(
        kernel,
        out_shape=jax.ShapeDtypeStruct((B * O, M), jnp.float32),
        grid_spec=pltpu.PrefetchScalarGridSpec(
            num_scalar_prefetch=0,
            grid=(n_blk,),
            in_specs=[
                pl.BlockSpec((M, M), lambda i: (0, 0)),              # operator (resident)
                pl.BlockSpec((BC, M), lambda i: (i, 0)),             # stacked features
                pl.BlockSpec((B_blk * O, K * BC), lambda i: (0, 0)),  # fused weight (resident)
                pl.BlockSpec((B_blk * O, 1), lambda i: (0, 0)),      # bias (resident)
            ],
            out_specs=pl.BlockSpec((B_blk * O, M), lambda i: (i, 0)),
        ),
        compiler_params=pltpu.CompilerParams(
            dimension_semantics=("parallel",)),
    )(m_op, x_flat, w_big, bias_big)
    return out_flat.reshape(B, O, N, L)


def dgcn_forward(x, adj, w, bias, *, K):
    """Convenience wrapper: prepare + apply in one call."""
    # TODO(synk): PyTorch DGCN always seeds Ls=[I, adj]; K=1 is ill-defined there.
    assert K >= 2, "DGCN semantics require K >= 2"
    B, C, N, L = x.shape
    B_blk = _pick_batch_block(B, C)
    m_op, w_big, bias_big = dgcn_prepare(adj, w, bias, L=L, K=K, B_blk=B_blk)
    return dgcn_apply(x, m_op, w_big, bias_big, K=K, B_blk=B_blk)


def dgcn_reference(x, adj, w, bias, K):
    """Pure-JAX f32 replica of the PyTorch forward (for correctness check)."""
    B, C, N, L = x.shape
    ls = [jnp.eye(N, dtype=x.dtype), adj]
    for _ in range(2, K):
        ls.append(2.0 * adj @ ls[-1] - ls[-2])
    lap = jnp.stack(ls, 0).transpose(0, 2, 1)                    # (K, N, N)
    y = jnp.einsum('bcnl,knq->bckql', x, lap)                    # (B, C, K, N, L)
    y = y.reshape(B, C * K, N, L)
    out = jnp.einsum('oj,bjnl->bonl', w, y) + bias[None, :, None, None]
    return out


if __name__ == "__main__":
    B, C_in, N, L = 2, 4, 16, 16
    K, C_out = 3, 8

    key = jax.random.PRNGKey(0)
    k1, k2, k3, k4 = jax.random.split(key, 4)
    x = jax.random.normal(k1, (B, C_in, N, L), dtype=jnp.float32)
    adj = 0.1 * jax.random.normal(k2, (N, N), dtype=jnp.float32)

    # Deterministic Conv2d(C_in*K -> C_out, 1x1) parameter init (kaiming-style bound).
    fan_in = C_in * K
    bound = 1.0 / float(np.sqrt(fan_in))
    w = jax.random.uniform(k3, (C_out, C_in * K), jnp.float32, -bound, bound)
    bias = jax.random.uniform(k4, (C_out,), jnp.float32, -bound, bound)

    out = dgcn_forward(x, adj, w, bias, K=K)
    out = jax.block_until_ready(out)

    ref = dgcn_reference(x, adj, w, bias, K)
    assert out.shape == (B, C_out, N, L)
    # bf16 operands on the recurrence matmuls -> loosened tolerance vs f32 reference.
    assert np.allclose(np.asarray(out), np.asarray(ref), rtol=2e-2, atol=2e-2), \
        "Pallas kernel mismatch vs reference"
    print("KERNEL_OK")
</pallas_src>

<mosaic_0001>
module attributes {stable_mosaic.version = 11 : i64} {
  func.func @_dgcn_kernel(%arg0: i32, %arg1: memref<256x256xbf16, #tpu.memory_space<vmem>>, %arg2: memref<8x256xf32, #tpu.memory_space<vmem>>, %arg3: memref<16x24xf32, #tpu.memory_space<vmem>>, %arg4: memref<16x1xf32, #tpu.memory_space<vmem>>, %arg5: memref<16x256xf32, #tpu.memory_space<vmem>>) attributes {dimension_semantics = [#tpu.dimension_semantics<parallel>], iteration_bounds = array<i64: 1>, scalar_prefetch = 0 : i64, scratch_operands = 0 : i64, tpu.core_type = #tpu.core_type<tc>, window_params = [{pipeline_mode = #tpu.pipeline_mode<synchronous>, transform_indices = @transform_0, window_bounds = array<i64: 256, 256>}, {transform_indices = @transform_1, window_bounds = array<i64: 8, 256>}, {pipeline_mode = #tpu.pipeline_mode<synchronous>, transform_indices = @transform_2, window_bounds = array<i64: 16, 24>}, {pipeline_mode = #tpu.pipeline_mode<synchronous>, transform_indices = @transform_3, window_bounds = array<i64: 16, 1>}, {transform_indices = @transform_4, window_bounds = array<i64: 16, 256>}]} {
    %c0 = arith.constant 0 : index
    %c0_0 = arith.constant 0 : index
    %0 = vector.load %arg1[%c0, %c0_0] : memref<256x256xbf16, #tpu.memory_space<vmem>>, vector<256x256xbf16>
    %c0_1 = arith.constant 0 : index
    %c0_2 = arith.constant 0 : index
    %1 = vector.load %arg2[%c0_1, %c0_2] : memref<8x256xf32, #tpu.memory_space<vmem>>, vector<8x256xf32>
    %2 = arith.truncf %1 : vector<8x256xf32> to vector<8x256xbf16>
    %cst = arith.constant dense<0.000000e+00> : vector<8x256xf32>
    %3 = tpu.matmul %2, %0, %cst {dimension_numbers = #tpu.dot_dimension_numbers<[1], [0], [0], [1], [0, 0, 1, 1], [], []>} : vector<8x256xbf16>, vector<256x256xbf16>, vector<8x256xf32> -> vector<8x256xf32>
    %4 = arith.truncf %3 : vector<8x256xf32> to vector<8x256xbf16>
    %cst_3 = arith.constant dense<0.000000e+00> : vector<8x256xf32>
    %5 = tpu.matmul %4, %0, %cst_3 {dimension_numbers = #tpu.dot_dimension_numbers<[1], [0], [0], [1], [0, 0, 1, 1], [], []>} : vector<8x256xbf16>, vector<256x256xbf16>, vector<8x256xf32> -> vector<8x256xf32>
    %cst_4 = arith.constant 2.000000e+00 : f32
    %6 = vector.broadcast %cst_4 : f32 to vector<8x256xf32>
    %7 = arith.mulf %6, %5 : vector<8x256xf32>
    %8 = arith.subf %7, %1 : vector<8x256xf32>
    %9 = tpu.concatenate %1, %3, %8 in 0 : vector<8x256xf32>, vector<8x256xf32>, vector<8x256xf32> -> vector<24x256xf32>
    %c0_5 = arith.constant 0 : index
    %c0_6 = arith.constant 0 : index
    %10 = vector.load %arg3[%c0_5, %c0_6] : memref<16x24xf32, #tpu.memory_space<vmem>>, vector<16x24xf32>
    %cst_7 = arith.constant dense<0.000000e+00> : vector<16x256xf32>
    %11 = tpu.matmul %10, %9, %cst_7 {dimension_numbers = #tpu.dot_dimension_numbers<[1], [0], [0], [1], [0, 0, 1, 1], [], []>} : vector<16x24xf32>, vector<24x256xf32>, vector<16x256xf32> -> vector<16x256xf32>
    %c0_8 = arith.constant 0 : index
    %c0_9 = arith.constant 0 : index
    %12 = vector.load %arg4[%c0_8, %c0_9] : memref<16x1xf32, #tpu.memory_space<vmem>>, vector<16x1xf32>
    %13 = vector.broadcast %12 : vector<16x1xf32> to vector<16x256xf32>
    %14 = arith.addf %11, %13 : vector<16x256xf32>
    %c0_10 = arith.constant 0 : index
    %c0_11 = arith.constant 0 : index
    %15 = vector.load %arg5[%c0_10, %c0_11] : memref<16x256xf32, #tpu.memory_space<vmem>>, vector<16x256xf32>
    tpu.vector_store %arg5[%c0_10, %c0_11], %14 {strides = array<i32>} : memref<16x256xf32, #tpu.memory_space<vmem>>, vector<16x256xf32>,
    return
  }
  func.func @transform_0(%arg0: i32) -> (i32, i32) {
    %c0_i32 = arith.constant 0 : i32
    %c0_i32_0 = arith.constant 0 : i32
    %c0_i32_1 = arith.constant 0 : i32
    return %c0_i32, %c0_i32_0 : i32, i32
  }
  func.func @transform_1(%arg0: i32) -> (i32, i32) {
    %c0_i32 = arith.constant 0 : i32
    %c0_i32_0 = arith.constant 0 : i32
    return %arg0, %c0_i32 : i32, i32
  }
  func.func @transform_2(%arg0: i32) -> (i32, i32) {
    %c0_i32 = arith.constant 0 : i32
    %c0_i32_0 = arith.constant 0 : i32
    %c0_i32_1 = arith.constant 0 : i32
    return %c0_i32, %c0_i32_0 : i32, i32
  }
  func.func @transform_3(%arg0: i32) -> (i32, i32) {
    %c0_i32 = arith.constant 0 : i32
    %c0_i32_0 = arith.constant 0 : i32
    %c0_i32_1 = arith.constant 0 : i32
    return %c0_i32, %c0_i32_0 : i32, i32
  }
  func.func @transform_4(%arg0: i32) -> (i32, i32) {
    %c0_i32 = arith.constant 0 : i32
    %c0_i32_0 = arith.constant 0 : i32
    return %arg0, %c0_i32 : i32, i32
  }
}

</mosaic_0001>

<bundles_post_ra>
// kernel: dgcn_apply.1
= control target key start
LH: loop header
LB: loop body
LE: loop exit
PB: predicated region body
PF: predicated region fallthrough
CT: control target
= control target key end

     0   :  { %9 = vsyncpa [#allocation3], 0  ;;  %s542_s15 = smov [#allocation2]   ;;  %s620_s0 = inlined_call_operand.hbm [shape: bf16[256,256], index: 0, kind: input, shape index: {}]   ;;  %s621_s1 = inlined_call_operand.vmem [shape: f32[8,256], index: 1, kind: input, shape index: {}]   ;;  %s622_s2 = inlined_call_operand.vmem [shape: f32[16,24], index: 2, kind: input, shape index: {}]   ;;  %s623_s3 = inlined_call_operand.vmem [shape: f32[16,1], index: 3, kind: input, shape index: {}]   ;;  %s624_s4 = inlined_call_operand.vmem [shape: f32[16,256], index: 4, kind: output, shape index: {}]  }
   0x1   :  { %s15_s16 = sshll.u32 %s542_s15, 4  ;;  %s518_s19 = scalar_lea.hbm %s620_s0, 4096  ;;  %s16_s16 = int_to_ptr.vmem [resolvable:$true] %s15_s16 }
   0x2   :  { %p519_p0 = scmp.ne.s32.totalorder %s620_s0, %s518_s19  ;;  %p522_p1 = scmp.lt.u32.totalorder %s518_s19, %s620_s0 }
   0x4   :  { %p524_p2 = pnand %p522_p1, %p519_p0 }
   0x6   :  { %527 = shalt.err (!%p524_p2)
}
   0x7   :  { %s528_s24 = scalar_lea.vmem %s16_s16, 4096  ;;  %p533_p4 = scmp.lt.s32.totalorder %s16_s16, %s16_s16 }
   0x8   :  { %p529_p3 = scmp.ne.s32.totalorder %s16_s16, %s528_s24  ;;  %p534_p5 = scmp.lt.s32.totalorder %s528_s24, %s528_s24 }
   0xa   :  { %p535_p6 = por %p534_p5, %p533_p4 }
   0xc   :  { %p536_p7 = pnand %p535_p6, %p529_p3 }
   0xe   :  { %539 = shalt.err (!%p536_p7)
}
   0xf   :  { %s543_s25 = smov 128   ;;  %s544_s26 = smov 8  }
  0x10   :  { %21 = dma.hbm_to_vmem [thread:$0]  %s620_s0, 4096, %s16_s16, [#allocation3], %s543_s25, %s543_s25, %s544_s26  }
  0x11   :  { %540 = dma.done.wait [#allocation3], 4096  }
  0x12   :  { %541 = vsyncadd [#allocation3], 4294963200  ;;  %v470_v0 = vld [vmem:[#allocation2 + $0x4] ss:$8 sps:$4 sm:$0xff]   ;;  %v472_v1 = vld [vmem:[#allocation2] ss:$8 sps:$4 sm:$0xff]  }
  0x13   :  { %227 = vmatprep.subr.bf16.mxu0 %v470_v0  ;;  %v473_v2 = vld [vmem:[#allocation2 + $0x14] ss:$8 sps:$4 sm:$0xff]   ;;  %270 = vmatprep.subr.bf16.mxu1 %v470_v0  ;;  %v475_v3 = vld [vmem:[#allocation2 + $0x10] ss:$8 sps:$4 sm:$0xff]   ;;  %v476_v4 = vld [vmem:[#allocation2 + $0x24] ss:$8 sps:$4 sm:$0xff]  }
  0x14   :  { %228 = vmatpush1.bf16.msra.mxu0 %v472_v1  ;;  %271 = vmatpush1.bf16.msra.mxu1 %v472_v1  ;;  %v478_v5 = vld [vmem:[#allocation2 + $0x20] ss:$8 sps:$4 sm:$0xff]   ;;  %v479_v6 = vld [vmem:[#allocation2 + $0x34] ss:$8 sps:$4 sm:$0xff]   ;;  %v481_v7 = vld [vmem:[#allocation2 + $0x30] ss:$8 sps:$4 sm:$0xff]  }
  0x15   :  { %229 = vmatprep.subr.bf16.mxu0 %v473_v2  ;;  %272 = vmatprep.subr.bf16.mxu1 %v473_v2  ;;  %v482_v8 = vld [vmem:[#allocation2 + $0x44] ss:$8 sps:$4 sm:$0xff]   ;;  %v484_v9 = vld [vmem:[#allocation2 + $0x40] ss:$8 sps:$4 sm:$0xff]   ;;  %v485_v10 = vld [vmem:[#allocation2 + $0x54] ss:$8 sps:$4 sm:$0xff]  }
  0x16   :  { %v487_v11 = vld [vmem:[#allocation2 + $0x50] ss:$8 sps:$4 sm:$0xff]   ;;  %v488_v12 = vld [vmem:[#allocation2 + $0x64] ss:$8 sps:$4 sm:$0xff]   ;;  %v490_v15 = vld [vmem:[#allocation2 + $0x60] ss:$8 sps:$4 sm:$0xff]  }
  0x17   :  { %v587_v13 = vld [vmem:[%s621_s1 + $0x8] sm:$0xff]  ;;  %v491_v16 = vld [vmem:[#allocation2 + $0x74] ss:$8 sps:$4 sm:$0xff]   ;;  %v493_v17 = vld [vmem:[#allocation2 + $0x70] ss:$8 sps:$4 sm:$0xff]   ;;  %v545_v44 = vmov 0.0  }
  0x18   :  { %230 = vmatpush1.bf16.msra.mxu0 %v475_v3  ;;  %273 = vmatpush1.bf16.msra.mxu1 %v475_v3  ;;  %v66_v14 = vpack.c.bf16 %v587_v13, %v587_v13  ;;  %v494_v18 = vld [vmem:[#allocation2 + $0x84] ss:$8 sps:$4 sm:$0xff]   ;;  %v496_v19 = vld [vmem:[#allocation2 + $0x80] ss:$8 sps:$4 sm:$0xff]   ;;  %v497_v20 = vld [vmem:[#allocation2 + $0x94] ss:$8 sps:$4 sm:$0xff]  }
  0x19   :  { %231 = vmatprep.subr.bf16.mxu0 %v476_v4  ;;  %274 = vmatprep.subr.bf16.mxu1 %v476_v4  ;;  %v499_v21 = vld [vmem:[#allocation2 + $0x90] ss:$8 sps:$4 sm:$0xff]   ;;  %v500_v22 = vld [vmem:[#allocation2 + $0xa4] ss:$8 sps:$4 sm:$0xff]   ;;  %v502_v23 = vld [vmem:[#allocation2 + $0xa0] ss:$8 sps:$4 sm:$0xff]  }
  0x1a   :  { %259 = vmatprep.mubr.bf16.mxu0 %v66_v14  ;;  %v503_v24 = vld [vmem:[#allocation2 + $0xb4] ss:$8 sps:$4 sm:$0xff]   ;;  %v505_v25 = vld [vmem:[#allocation2 + $0xb0] ss:$8 sps:$4 sm:$0xff]   ;;  %v506_v26 = vld [vmem:[#allocation2 + $0xc4] ss:$8 sps:$4 sm:$0xff]  }
  0x1b   :  { %v508_v27 = vld [vmem:[#allocation2 + $0xc0] ss:$8 sps:$4 sm:$0xff]   ;;  %v509_v28 = vld [vmem:[#allocation2 + $0xd4] ss:$8 sps:$4 sm:$0xff]   ;;  %v511_v29 = vld [vmem:[#allocation2 + $0xd0] ss:$8 sps:$4 sm:$0xff]  }
  0x1c   :  { %232 = vmatpush1.bf16.msra.mxu0 %v478_v5  ;;  %275 = vmatpush1.bf16.msra.mxu1 %v478_v5  ;;  %v512_v30 = vld [vmem:[#allocation2 + $0xe4] ss:$8 sps:$4 sm:$0xff]   ;;  %v514_v31 = vld [vmem:[#allocation2 + $0xe0] ss:$8 sps:$4 sm:$0xff]   ;;  %v515_v32 = vld [vmem:[#allocation2 + $0xf4] ss:$8 sps:$4 sm:$0xff]  }
  0x1d   :  { %233 = vmatprep.subr.bf16.mxu0 %v479_v6  ;;  %276 = vmatprep.subr.bf16.mxu1 %v479_v6  ;;  %v517_v33 = vld [vmem:[#allocation2 + $0xf0] ss:$8 sps:$4 sm:$0xff]   ;;  %v63_v34 = vld [vmem:[%s621_s1] sm:$0xff]  ;;  %v546_v46 = vmov 0   ;;  %v318_v47 = vld [vmem:[%s623_s3 + $0x8] sm:$0xff]  ;;  %vm329_vm0 = vcmask 195584  }
  0x1e   :  { %v65_v35 = vpack.c.bf16 %v63_v34, %v63_v34  ;;  %v317_v45 = vld [vmem:[%s623_s3] sm:$0xff]  ;;  %469 = vset.pattern.permute.xlu0 %v546_v46  ;;  %v316_v57 = vld [vmem:[%s622_s2 + $0x8] sm:$0xff] }
  0x1f   :  { %321 = vperm.xlu0 %469, %v317_v45   ;;  %v315_v56 = vld [vmem:[%s622_s2] sm:$0xff] }
  0x20   :  { %234 = vmatpush1.bf16.msra.mxu0 %v481_v7  ;;  %277 = vmatpush1.bf16.msra.mxu1 %v481_v7 }
  0x21   :  { %235 = vmatprep.subr.bf16.mxu0 %v482_v8  ;;  %278 = vmatprep.subr.bf16.mxu1 %v482_v8 }
  0x23   :  { %326 = vperm.xlu0 %469, %v318_v47  }
  0x24   :  { %236 = vmatpush1.bf16.msra.mxu0 %v484_v9  ;;  %279 = vmatpush1.bf16.msra.mxu1 %v484_v9 }
  0x25   :  { %237 = vmatprep.subr.bf16.mxu0 %v485_v10  ;;  %280 = vmatprep.subr.bf16.mxu1 %v485_v10 }
  0x28   :  { %238 = vmatpush1.bf16.msra.mxu0 %v487_v11  ;;  %281 = vmatpush1.bf16.msra.mxu1 %v487_v11 }
  0x29   :  { %239 = vmatprep.subr.bf16.mxu0 %v488_v12  ;;  %282 = vmatprep.subr.bf16.mxu1 %v488_v12 }
  0x2c   :  { %240 = vmatpush1.bf16.msra.mxu0 %v490_v15  ;;  %283 = vmatpush1.bf16.msra.mxu1 %v490_v15 }
  0x2d   :  { %241 = vmatprep.subr.bf16.mxu0 %v491_v16  ;;  %284 = vmatprep.subr.bf16.mxu1 %v491_v16 }
  0x30   :  { %242 = vmatpush1.bf16.msra.mxu0 %v493_v17  ;;  %285 = vmatpush1.bf16.msra.mxu1 %v493_v17 }
  0x31   :  { %243 = vmatprep.subr.bf16.mxu0 %v494_v18  ;;  %286 = vmatprep.subr.bf16.mxu1 %v494_v18 }
  0x34   :  { %244 = vmatpush1.bf16.msra.mxu0 %v496_v19  ;;  %287 = vmatpush1.bf16.msra.mxu1 %v496_v19 }
  0x35   :  { %245 = vmatprep.subr.bf16.mxu0 %v497_v20  ;;  %288 = vmatprep.subr.bf16.mxu1 %v497_v20 }
  0x38   :  { %246 = vmatpush1.bf16.msra.mxu0 %v499_v21  ;;  %289 = vmatpush1.bf16.msra.mxu1 %v499_v21 }
  0x39   :  { %247 = vmatprep.subr.bf16.mxu0 %v500_v22  ;;  %290 = vmatprep.subr.bf16.mxu1 %v500_v22 }
  0x3c   :  { %248 = vmatpush1.bf16.msra.mxu0 %v502_v23  ;;  %291 = vmatpush1.bf16.msra.mxu1 %v502_v23 }
  0x3d   :  { %249 = vmatprep.subr.bf16.mxu0 %v503_v24  ;;  %292 = vmatprep.subr.bf16.mxu1 %v503_v24 }
  0x40   :  { %250 = vmatpush1.bf16.msra.mxu0 %v505_v25  ;;  %293 = vmatpush1.bf16.msra.mxu1 %v505_v25 }
  0x41   :  { %251 = vmatprep.subr.bf16.mxu0 %v506_v26  ;;  %294 = vmatprep.subr.bf16.mxu1 %v506_v26 }
  0x44   :  { %252 = vmatpush1.bf16.msra.mxu0 %v508_v27  ;;  %295 = vmatpush1.bf16.msra.mxu1 %v508_v27 }
  0x45   :  { %253 = vmatprep.subr.bf16.mxu0 %v509_v28  ;;  %296 = vmatprep.subr.bf16.mxu1 %v509_v28 }
  0x48   :  { %254 = vmatpush1.bf16.msra.mxu0 %v511_v29  ;;  %297 = vmatpush1.bf16.msra.mxu1 %v511_v29 }
  0x49   :  { %255 = vmatprep.subr.bf16.mxu0 %v512_v30  ;;  %298 = vmatprep.subr.bf16.mxu1 %v512_v30 }
  0x4c   :  { %256 = vmatpush1.bf16.msra.mxu0 %v514_v31  ;;  %299 = vmatpush1.bf16.msra.mxu1 %v514_v31 }
  0x4d   :  { %257 = vmatprep.subr.bf16.mxu0 %v515_v32  ;;  %300 = vmatprep.subr.bf16.mxu1 %v515_v32 }
  0x50   :  { %258 = vmatpush1.bf16.msra.mxu0 %v517_v33  ;;  %301 = vmatpush1.bf16.msra.mxu1 %v517_v33 }
  0x53   :  { %260 = vmatmul.mubr.bf16.vlgmr.msra.gmra.mrb[0].mxu0 %v65_v35 }
  0x54   :  { %400 = vmatprep.mubr.f32.mxu0 %v545_v44 }
  0x9e   :  { %v322_v58 = vpop.permute.xlu0 %321 }
  0xa2   :  { %v327_v59 = vpop.permute.xlu0 %326 }
 0x126   :  { %v261_v36 = vpop.f32.mrb[0].mxu0 }
 0x127   :  { %v263_v37 = vpop.f32.mrb[1].mxu0  ;;  %v268_v41 = vpack.c.bf16 %v261_v36, %v261_v36  ;;  %v458_v43 = vpack.c.bf16 %v261_v36, %v63_v34 }
 0x128   :  { %v456_v38 = vpack.c.bf16 %v263_v37, %v587_v13  ;;  %v265_v39 = vpop.f32.mrb[2].mxu0  ;;  %v269_v40 = vpack.c.bf16 %v263_v37, %v263_v37 }
 0x129   :  { %v266_v42 = vpop.f32.mrb[3].mxu0 }
 0x12a   :  { %302 = vmatprep.mubr.bf16.mxu1 %v269_v40  ;;  %457 = vmatprep.subr.bf16.mxu0 %v456_v38 }
 0x12b   :  { %460 = vmatprep.subr.bf16.mxu1 %v456_v38  ;;  %303 = vmatmul.mubr.bf16.vlgmr.msra.gmra.mrb[0].mxu1 %v268_v41 }
 0x12c   :  { %459 = vmatpush1.bf16.msra.mxu0 %v458_v43  ;;  %462 = vmatpush1.bf16.msra.mxu1 %v458_v43 }
 0x12d   :  { %406 = vmatprep.mubr.f32.mxu1 %v545_v44 }
 0x1fe   :  { %v304_v48 = vpop.f32.mrb[0].mxu1 }
 0x1ff   :  { %v311_v49 = vmul.f32 2.0, %v304_v48  ;;  %v306_v50 = vpop.f32.mrb[1].mxu1 }
 0x200   :  { %v312_v51 = vmul.f32 2.0, %v306_v50  ;;  %v308_v52 = vpop.f32.mrb[2].mxu1 }
 0x201   :  { %v309_v53 = vpop.f32.mrb[3].mxu1  ;;  %v313_v55 = vsub.f32 %v311_v49, %v63_v34 }
 0x202   :  { %v314_v54 = vsub.f32 %v312_v51, %v587_v13 }
 0x204   :  { %340 = vmatprep.subr.mxu0 %v314_v54  ;;  %461 = vmatprep.subr.mxu1 %v314_v54 }
 0x205   :  { %341 = vmatpush1.msra.mxu0 %v313_v55  ;;  %463 = vmatpush1.msra.mxu1 %v313_v55 }
 0x206   :  { %454 = vmatmul.mubr.msk.f32.vlgmr.msra.gmra.mrb[4].mxu0 %vm329_vm0, %v315_v56  ;;  %455 = vmatmul.mubr.msk.f32.vlgmr.msra.gmra.mrb[4].mxu1 %vm329_vm0, %v316_v57 }
 0x2d9   :  { %v402_v60 = vpop.f32.mrb[4].mxu0  ;;  %v408_v61 = vpop.f32.mrb[4].mxu1 }
 0x2da   :  { %v403_v62 = vadd.f32 %v402_v60, %v322_v58  ;;  %v409_v63 = vadd.f32 %v408_v61, %v327_v59  ;;  %v404_v0 = vpop.f32.mrb[5].mxu0  ;;  %v410_v1 = vpop.f32.mrb[5].mxu1 }
 0x2db   :  { %v405_v2 = vadd.f32 %v404_v0, %v322_v58  ;;  %v411_v3 = vadd.f32 %v410_v1, %v327_v59 }
 0x2dc   :  { %413 = vst [vmem:[%s624_s4] sm:$0xff] %v403_v62  ;;  %415 = vst [vmem:[%s624_s4 + $0x10] sm:$0xff] %v409_v63 }
 0x2dd   :  { %414 = vst [vmem:[%s624_s4 + $0x8] sm:$0xff] %v405_v2  ;;  %416 = vst [vmem:[%s624_s4 + $0x18] sm:$0xff] %v411_v3 }
 0x2de   :  { %421 = vsyncpa [#allocation3], 1 }

</bundles_post_ra>
